<compile_context>
chip_gen: v6e
topology: v6e:2x2x1
jax: 0.10.0
libtpu: 0.0.40
codegen_flags: <defaults>
</compile_context>

<pallas_src>
import functools

import jax
import jax.numpy as jnp
from jax.experimental import pallas as pl
from jax.experimental.pallas import tpu as pltpu

_LANE = 128      # lane width (last-dim alignment for lane-dense stores / MXU N)
_SUBLANE = 8     # sublane alignment for the second-to-last dim
_MAX_TM = 512    # max dst-row tile (sized well under default scoped VMEM)


def _round_up(x, m):
    return ((x + m - 1) // m) * m


def _dst_pad(n_dst):
    """Padded dst-row count: multiple of 8, and multiple of _MAX_TM when tiled."""
    n = _round_up(n_dst, _SUBLANE)
    if n > _MAX_TM:
        n = _round_up(n_dst, _MAX_TM)
    return n


# ----------------------------------------------------------------------------
# Pallas kernels: fused per-dst-ntype RGCN aggregation
#   weighted : h_dst_tile = sum_r A[r, tile] @ (X[r] @ W[r])   (+ optional ReLU)
#   no-weight: h_dst_tile = sum_r A[r, tile] @  X[r]           (+ optional ReLU)
# Grid = (dst_tiles, relations); the output block is resident across the
# (innermost, "arbitrary") relation axis and is accumulated in f32 in place.
# ----------------------------------------------------------------------------
def _rgcn_weighted_kernel(a_ref, x_ref, w_ref, o_ref, *, apply_relu):
    r = pl.program_id(1)
    # message: X_src @ W_rel (bf16 x bf16 -> f32 on the MXU)
    xw = jnp.dot(x_ref[...], w_ref[...], preferred_element_type=jnp.float32)
    # mean aggregation: A_rel @ (X W), bf16 operands, f32 accumulation
    contrib = jnp.dot(a_ref[...], xw.astype(jnp.bfloat16),
                      preferred_element_type=jnp.float32)

    @pl.when(r == 0)
    def _():
        o_ref[...] = contrib

    @pl.when(r != 0)
    def _():
        o_ref[...] += contrib

    if apply_relu:
        @pl.when(r == pl.num_programs(1) - 1)
        def _():
            o_ref[...] = jnp.maximum(o_ref[...], 0.0)


def _rgcn_noweight_kernel(a_ref, x_ref, o_ref, *, apply_relu):
    r = pl.program_id(1)
    contrib = jnp.dot(a_ref[...], x_ref[...], preferred_element_type=jnp.float32)

    @pl.when(r == 0)
    def _():
        o_ref[...] = contrib

    @pl.when(r != 0)
    def _():
        o_ref[...] += contrib

    if apply_relu:
        @pl.when(r == pl.num_programs(1) - 1)
        def _():
            o_ref[...] = jnp.maximum(o_ref[...], 0.0)


def _dst_tile(n_dst_pad):
    return _MAX_TM if n_dst_pad > _MAX_TM else n_dst_pad


def rgcn_weighted_aggregate(a_stack, x_stack, w_stack, apply_relu):
    """sum_r A[r] @ (X[r] @ W[r]), bf16 inputs, f32 out, optional fused ReLU."""
    R, n_dst_pad, n_src_pad = a_stack.shape
    f_in_pad = x_stack.shape[-1]
    f_out_pad = w_stack.shape[-1]
    tm = _dst_tile(n_dst_pad)
    kernel = functools.partial(_rgcn_weighted_kernel, apply_relu=apply_relu)
    return pl.pallas_call(
        kernel,
        out_shape=jax.ShapeDtypeStruct((n_dst_pad, f_out_pad), jnp.float32),
        grid_spec=pltpu.PrefetchScalarGridSpec(
            num_scalar_prefetch=0,
            grid=(n_dst_pad // tm, R),
            in_specs=[
                pl.BlockSpec((pl.Squeezed(), tm, n_src_pad),
                             lambda m, r: (r, m, 0)),
                pl.BlockSpec((pl.Squeezed(), n_src_pad, f_in_pad),
                             lambda m, r: (r, 0, 0)),
                pl.BlockSpec((pl.Squeezed(), f_in_pad, f_out_pad),
                             lambda m, r: (r, 0, 0)),
            ],
            out_specs=pl.BlockSpec((tm, f_out_pad), lambda m, r: (m, 0)),
        ),
        compiler_params=pltpu.CompilerParams(
            dimension_semantics=("parallel", "arbitrary")),
    )(a_stack, x_stack, w_stack)


def rgcn_noweight_aggregate(a_stack, x_stack, apply_relu):
    """sum_r A[r] @ X[r] (use_weight=False layer), bf16 inputs, f32 out."""
    R, n_dst_pad, n_src_pad = a_stack.shape
    f_pad = x_stack.shape[-1]
    tm = _dst_tile(n_dst_pad)
    kernel = functools.partial(_rgcn_noweight_kernel, apply_relu=apply_relu)
    return pl.pallas_call(
        kernel,
        out_shape=jax.ShapeDtypeStruct((n_dst_pad, f_pad), jnp.float32),
        grid_spec=pltpu.PrefetchScalarGridSpec(
            num_scalar_prefetch=0,
            grid=(n_dst_pad // tm, R),
            in_specs=[
                pl.BlockSpec((pl.Squeezed(), tm, n_src_pad),
                             lambda m, r: (r, m, 0)),
                pl.BlockSpec((pl.Squeezed(), n_src_pad, f_pad),
                             lambda m, r: (r, 0, 0)),
            ],
            out_specs=pl.BlockSpec((tm, f_pad), lambda m, r: (m, 0)),
        ),
        compiler_params=pltpu.CompilerParams(
            dimension_semantics=("parallel", "arbitrary")),
    )(a_stack, x_stack)


# ----------------------------------------------------------------------------
# Glue: heterograph bookkeeping in plain JAX
# ----------------------------------------------------------------------------
def mean_adjacency(src_ids, dst_ids, n_dst, n_src):
    """Dense dst x src adjacency, row-normalized (DGL fn.mean over in-edges)."""
    a = jnp.zeros((n_dst, n_src), jnp.float32)
    a = a.at[dst_ids, src_ids].add(1.0)
    deg = a.sum(axis=1, keepdims=True)
    return jnp.where(deg > 0, a / jnp.maximum(deg, 1.0), 0.0)


def build_graph_blocks(adjs, canonical_etypes, node_counts):
    """Group relations per dst ntype; pad/stack/bf16-cast A once per forward."""
    # TODO(synk): real mini-batch graphs should use a gather + segment-mean
    # kernel instead of a dense padded adjacency (A is O(n_dst*n_src) dense).
    dst_types = sorted({d for (_, _, d) in canonical_etypes})
    blocks = {}
    for dt in dst_types:
        rels = [(i, s, e) for i, (s, e, d) in enumerate(canonical_etypes)
                if d == dt]
        if not rels:
            continue
        n_dst = node_counts[dt]
        n_dst_pad = _dst_pad(n_dst)
        n_src_pad = _round_up(max(node_counts[s] for _, s, _ in rels), _SUBLANE)
        a_stack = [
            jnp.pad(adjs[i], ((0, n_dst_pad - adjs[i].shape[0]),
                              (0, n_src_pad - adjs[i].shape[1])))
            for i, _, _ in rels
        ]
        blocks[dt] = {
            "rels": rels,                       # (etype idx, src ntype, etype)
            "n_dst": n_dst,
            "n_src_pad": n_src_pad,
            "a_stack": jnp.stack(a_stack).astype(jnp.bfloat16),
        }
    return blocks


def basis_to_etype_weights(weight, w_comp, rel_names):
    """RelGraphConvHetero.basis_weight(): per-etype weight from basis decomp."""
    b, fin, fout = weight.shape
    if w_comp is not None:  # num_bases < num_rels
        w = (w_comp @ weight.reshape(b, fin * fout)).reshape(
            len(rel_names), fin, fout)
    else:
        w = weight
    return {rel_names[i]: w[i] for i in range(len(rel_names))}


def pad_weights(w_by_etype, f_in_pad, f_out_pad):
    """Zero-pad weights to lane-dense (128-multiple) shapes and cast to bf16."""
    return {
        e: jnp.pad(w, ((0, f_in_pad - w.shape[0]),
                       (0, f_out_pad - w.shape[1]))).astype(jnp.bfloat16)
        for e, w in w_by_etype.items()
    }


def rel_layer(xs, blocks, w_by_etype, apply_relu):
    """One RelGraphConvHetero layer (hot path runs in the Pallas kernels)."""
    new_xs = {}
    for dt, blk in blocks.items():
        sel = [j for j, (_, s, _) in enumerate(blk["rels"]) if s in xs]
        if not sel:
            continue  # dst ntype with no in-relations from featured src ntypes
        rels = [blk["rels"][j] for j in sel]
        a_stack = blk["a_stack"]
        if len(sel) != len(blk["rels"]):
            a_stack = a_stack[jnp.asarray(sel)]
        n_src_pad = blk["n_src_pad"]
        # TODO(synk): padding every relation to n_src_pad wastes MXU/DMA when
        # node counts are skewed; group by src ntype or skip padded K tiles.
        x_stack = jnp.stack([
            jnp.pad(xs[s], ((0, n_src_pad - xs[s].shape[0]), (0, 0)))
            for _, s, _ in rels
        ]).astype(jnp.bfloat16)
        if w_by_etype is None:  # use_weight=False layer
            out = rgcn_noweight_aggregate(a_stack, x_stack, apply_relu)
        else:
            w_stack = jnp.stack([w_by_etype[e] for _, _, e in rels])
            out = rgcn_weighted_aggregate(a_stack, x_stack, w_stack, apply_relu)
        new_xs[dt] = out[:blk["n_dst"]]   # drop padded dst rows (exact zeros)
    return new_xs


def entity_classify_forward(xs, blocks, rel_names, params, h_dim, out_dim):
    """EntityClassify.forward: layer0(no-weight,relu) -> hidden(relu) -> out."""
    f_hid_pad = _round_up(h_dim, _LANE)
    f_out_pad = _round_up(out_dim, _LANE)
    # Lane-dense features: pad feature dim to a multiple of 128 (exact zeros).
    h = {nt: jnp.pad(x, ((0, 0), (0, f_hid_pad - x.shape[1])))
         for nt, x in xs.items()}
    # Layer 0: use_weight=False, ReLU.
    h = rel_layer(h, blocks, None, True)
    # Hidden layers: basis weights, ReLU.
    for (w, c) in params["hidden"]:
        w_by_e = pad_weights(basis_to_etype_weights(w, c, rel_names),
                             f_hid_pad, f_hid_pad)
        h = rel_layer(h, blocks, w_by_e, True)
    # Output layer: basis weights, no activation.
    w, c = params["out"]
    w_by_e = pad_weights(basis_to_etype_weights(w, c, rel_names),
                         f_hid_pad, f_out_pad)
    h = rel_layer(h, blocks, w_by_e, False)
    # Drop padded output-feature columns.
    return {nt: v[:, :out_dim] for nt, v in h.items()}
    # TODO(synk): h_bias exists in the PyTorch module but is never applied in
    # its forward(); intentionally omitted here as well (dropout=0, no self loop).


# ----------------------------------------------------------------------------
# Pure-JAX reference (same math, same bf16 rounding points, no Pallas)
# ----------------------------------------------------------------------------
def _ref_layer(xs, adjs, cets, w_by_etype, apply_relu):
    out = {}
    for i, (s, e, d) in enumerate(cets):
        if s not in xs:
            continue
        x = xs[s].astype(jnp.bfloat16)
        if w_by_etype is None:
            msg = x
        else:
            msg = jnp.dot(x, w_by_etype[e].astype(jnp.bfloat16),
                          preferred_element_type=jnp.float32).astype(jnp.bfloat16)
        out[d] = out.get(d, 0.0) + jnp.dot(
            adjs[i].astype(jnp.bfloat16), msg,
            preferred_element_type=jnp.float32)
    if apply_relu:
        out = {k: jnp.maximum(v, 0.0) for k, v in out.items()}
    return out


def _ref_forward(xs, adjs, cets, rel_names, params):
    h = _ref_layer(xs, adjs, cets, None, True)
    for (w, c) in params["hidden"]:
        h = _ref_layer(h, adjs, cets,
                       basis_to_etype_weights(w, c, rel_names), True)
    w, c = params["out"]
    return _ref_layer(h, adjs, cets,
                      basis_to_etype_weights(w, c, rel_names), False)


if __name__ == "__main__":
    key = jax.random.PRNGKey(0)
    h_dim, out_dim = 32, 8
    num_bases = 2                      # < num_rels -> exercises w_comp path
    node_counts = {"user": 16, "item": 8}
    canonical_etypes = [("user", "follows", "user"),
                        ("user", "buys", "item"),
                        ("item", "bought-by", "user")]
    rel_names = sorted({e for (_, e, _) in canonical_etypes})
    num_rels = len(rel_names)
    n_edges = {"follows": 40, "buys": 30, "bought-by": 30}

    keys = iter(jax.random.split(key, 32))

    # Synthetic heterograph: dense mean-adjacency per canonical etype.
    adjs = []
    for (s, e, d) in canonical_etypes:
        ne = n_edges[e]
        src = jax.random.randint(next(keys), (ne,), 0, node_counts[s])
        dst = jax.random.randint(next(keys), (ne,), 0, node_counts[d])
        adjs.append(mean_adjacency(src, dst, node_counts[d], node_counts[s]))

    # Input node features per ntype (h_dim, as in entity_classify_mb).
    xs = {"user": jax.random.normal(next(keys), (node_counts["user"], h_dim),
                                    jnp.float32),
          "item": jax.random.normal(next(keys), (node_counts["item"], h_dim),
                                    jnp.float32)}

    # Deterministic xavier-uniform-style init (gain = relu gain = sqrt(2)).
    def xavier(k, shape, fan_in, fan_out):
        bound = jnp.sqrt(2.0) * jnp.sqrt(6.0 / (fan_in + fan_out))
        return jax.random.uniform(k, shape, jnp.float32, -bound, bound)

    # Hidden layer (num_hidden_layers=1): basis weight h_dim -> h_dim.
    w_hid = xavier(next(keys), (num_bases, h_dim, h_dim),
                   h_dim * h_dim, num_bases * h_dim)
    c_hid = xavier(next(keys), (num_rels, num_bases), num_bases, num_rels)
    # Output layer: basis weight h_dim -> out_dim.
    w_out = xavier(next(keys), (num_bases, h_dim, out_dim),
                   h_dim * out_dim, num_bases * out_dim)
    c_out = xavier(next(keys), (num_rels, num_bases), num_bases, num_rels)
    params = {"hidden": [(w_hid, c_hid)], "out": (w_out, c_out)}

    # Per-graph preprocessing done once (A padded/stacked/bf16-cast once).
    blocks = build_graph_blocks(adjs, canonical_etypes, node_counts)

    out = entity_classify_forward(xs, blocks, rel_names, params, h_dim, out_dim)
    out = jax.tree_util.tree_map(jax.block_until_ready, out)

    ref = _ref_forward(xs, adjs, canonical_etypes, rel_names, params)
    for nt in out:
        assert out[nt].shape == (node_counts[nt], out_dim)
        # bf16 matmul inputs -> loosened tolerance vs. the f32-input version.
        assert jnp.allclose(out[nt], ref[nt], atol=1e-2, rtol=1e-2), nt

    print("KERNEL_OK")
</pallas_src>

<mosaic_0001>
module attributes {stable_mosaic.version = 11 : i64} {
  func.func @_rgcn_noweight_kernel(%arg0: i32, %arg1: i32, %arg2: memref<1x8x16xbf16, #tpu.memory_space<vmem>>, %arg3: memref<1x16x128xbf16, #tpu.memory_space<vmem>>, %arg4: memref<8x128xf32, #tpu.memory_space<vmem>>) attributes {dimension_semantics = [#tpu.dimension_semantics<parallel>, #tpu.dimension_semantics<arbitrary>], iteration_bounds = array<i64: 1, 1>, scalar_prefetch = 0 : i64, scratch_operands = 0 : i64, tpu.core_type = #tpu.core_type<tc>, window_params = [{transform_indices = @transform_0, window_bounds = array<i64: 1, 8, 16>}, {transform_indices = @transform_1, window_bounds = array<i64: 1, 16, 128>}, {transform_indices = @transform_2, window_bounds = array<i64: 8, 128>}]} {
    %c0 = arith.constant 0 : index
    %c0_0 = arith.constant 0 : index
    %c0_1 = arith.constant 0 : index
    %0 = vector.load %arg2[%c0, %c0_0, %c0_1] : memref<1x8x16xbf16, #tpu.memory_space<vmem>>, vector<1x8x16xbf16>
    %1 = vector.shape_cast %0 : vector<1x8x16xbf16> to vector<8x16xbf16>
    %c0_2 = arith.constant 0 : index
    %c0_3 = arith.constant 0 : index
    %c0_4 = arith.constant 0 : index
    %2 = vector.load %arg3[%c0_2, %c0_3, %c0_4] : memref<1x16x128xbf16, #tpu.memory_space<vmem>>, vector<1x16x128xbf16>
    %3 = vector.shape_cast %2 : vector<1x16x128xbf16> to vector<16x128xbf16>
    %cst = arith.constant dense<0.000000e+00> : vector<8x128xf32>
    %4 = tpu.matmul %1, %3, %cst {dimension_numbers = #tpu.dot_dimension_numbers<[1], [0], [0], [1], [0, 0, 1, 1], [], []>} : vector<8x16xbf16>, vector<16x128xbf16>, vector<8x128xf32> -> vector<8x128xf32>
    %c0_i32 = arith.constant 0 : i32
    %5 = arith.cmpi eq, %arg1, %c0_i32 : i32
    %6 = arith.extui %5 : i1 to i32
    %c0_i32_5 = arith.constant 0 : i32
    %7 = arith.cmpi ne, %6, %c0_i32_5 : i32
    scf.if %7 {
      %c0_10 = arith.constant 0 : index
      %c0_11 = arith.constant 0 : index
      %14 = vector.load %arg4[%c0_10, %c0_11] : memref<8x128xf32, #tpu.memory_space<vmem>>, vector<8x128xf32>
      tpu.vector_store %arg4[%c0_10, %c0_11], %4 {strides = array<i32>} : memref<8x128xf32, #tpu.memory_space<vmem>>, vector<8x128xf32>,
    } else {
    }
    %c0_i32_6 = arith.constant 0 : i32
    %8 = arith.cmpi ne, %arg1, %c0_i32_6 : i32
    %9 = arith.extui %8 : i1 to i32
    %c0_i32_7 = arith.constant 0 : i32
    %10 = arith.cmpi ne, %9, %c0_i32_7 : i32
    scf.if %10 {
      %c0_10 = arith.constant 0 : index
      %c0_11 = arith.constant 0 : index
      %14 = vector.load %arg4[%c0_10, %c0_11] : memref<8x128xf32, #tpu.memory_space<vmem>>, vector<8x128xf32>
      %15 = arith.addf %14, %4 : vector<8x128xf32>
      %c0_12 = arith.constant 0 : index
      %c0_13 = arith.constant 0 : index
      %16 = vector.load %arg4[%c0_12, %c0_13] : memref<8x128xf32, #tpu.memory_space<vmem>>, vector<8x128xf32>
      tpu.vector_store %arg4[%c0_12, %c0_13], %15 {strides = array<i32>} : memref<8x128xf32, #tpu.memory_space<vmem>>, vector<8x128xf32>,
    } else {
    }
    %c0_i32_8 = arith.constant 0 : i32
    %11 = arith.cmpi eq, %arg1, %c0_i32_8 : i32
    %12 = arith.extui %11 : i1 to i32
    %c0_i32_9 = arith.constant 0 : i32
    %13 = arith.cmpi ne, %12, %c0_i32_9 : i32
    scf.if %13 {
      %c0_10 = arith.constant 0 : index
      %c0_11 = arith.constant 0 : index
      %14 = vector.load %arg4[%c0_10, %c0_11] : memref<8x128xf32, #tpu.memory_space<vmem>>, vector<8x128xf32>
      %cst_12 = arith.constant 0.000000e+00 : f32
      %15 = vector.broadcast %cst_12 : f32 to vector<8x128xf32>
      %16 = arith.maximumf %14, %15 : vector<8x128xf32>
      %c0_13 = arith.constant 0 : index
      %c0_14 = arith.constant 0 : index
      %17 = vector.load %arg4[%c0_13, %c0_14] : memref<8x128xf32, #tpu.memory_space<vmem>>, vector<8x128xf32>
      tpu.vector_store %arg4[%c0_13, %c0_14], %16 {strides = array<i32>} : memref<8x128xf32, #tpu.memory_space<vmem>>, vector<8x128xf32>,
    } else {
    }
    return
  }
  func.func @transform_0(%arg0: i32, %arg1: i32) -> (i32, i32, i32) {
    %c0_i32 = arith.constant 0 : i32
    %c0_i32_0 = arith.constant 0 : i32
    return %arg1, %arg0, %c0_i32 : i32, i32, i32
  }
  func.func @transform_1(%arg0: i32, %arg1: i32) -> (i32, i32, i32) {
    %c0_i32 = arith.constant 0 : i32
    %c0_i32_0 = arith.constant 0 : i32
    %c0_i32_1 = arith.constant 0 : i32
    return %arg1, %c0_i32, %c0_i32_0 : i32, i32, i32
  }
  func.func @transform_2(%arg0: i32, %arg1: i32) -> (i32, i32) {
    %c0_i32 = arith.constant 0 : i32
    %c0_i32_0 = arith.constant 0 : i32
    return %arg0, %c0_i32 : i32, i32
  }
}

</mosaic_0001>

<bundles_post_ra>
// kernel: tpu_custom_call.1
= control target key start
LH: loop header
LB: loop body
LE: loop exit
PB: predicated region body
PF: predicated region fallthrough
CT: control target
= control target key end

     0   :  { %7 = vsyncpa [#allocation3], 0  ;;  %s241_s0 = inlined_call_operand.hbm [shape: bf16[1,8,16], index: 0, kind: input, shape index: {}]   ;;  %s242_s1 = inlined_call_operand.hbm [shape: bf16[1,16,128], index: 1, kind: input, shape index: {}]   ;;  %s243_s2 = inlined_call_operand.hbm [shape: f32[8,128], index: 2, kind: output, shape index: {}]  }
   0x1   :  { %8 = vsyncpa [#allocation6], 0 }
   0x2   :  { %9 = vsyncpa [#allocation4], 0  ;;  %s210_s9 = smov [#allocation2]   ;;  %s211_s11 = smov [#allocation5]  }
   0x3   :  { %s16_s10 = sshll.u32 %s210_s9, 4  ;;  %s25_s12 = sshll.u32 %s211_s11, 4  ;;  %s17_s10 = int_to_ptr.vmem [resolvable:$true] %s16_s10  ;;  %s26_s12 = int_to_ptr.vmem [resolvable:$true] %s25_s12 }
   0x4   :  { %s152_s13 = scalar_lea.vmem %s17_s10, 64  ;;  %p157_p1 = scmp.lt.s32.totalorder %s17_s10, %s17_s10 }
   0x5   :  { %p153_p0 = scmp.ne.s32.totalorder %s17_s10, %s152_s13  ;;  %p158_p2 = scmp.lt.s32.totalorder %s152_s13, %s152_s13 }
   0x7   :  { %p159_p3 = por %p158_p2, %p157_p1 }
   0x9   :  { %p160_p4 = pnand %p159_p3, %p153_p0 }
   0xb   :  { %163 = shalt.err (!%p160_p4)
}
   0xc   :  { %19 = dma.hbm_to_vmem [thread:$0]  %s241_s0, 64, %s17_s10, [#allocation3]  }
   0xd   :  { %s172_s16 = scalar_lea.vmem %s26_s12, 128  ;;  %p177_p6 = scmp.lt.s32.totalorder %s26_s12, %s26_s12 }
   0xe   :  { %p173_p5 = scmp.ne.s32.totalorder %s26_s12, %s172_s16  ;;  %p178_p7 = scmp.lt.s32.totalorder %s172_s16, %s172_s16 }
  0x10   :  { %p179_p8 = por %p178_p7, %p177_p6 }
  0x12   :  { %p180_p9 = pnand %p179_p8, %p173_p5 }
  0x14   :  { %183 = shalt.err (!%p180_p9)
}
  0x15   :  { %s212_s17 = smov 64   ;;  %s213_s18 = smov 4  }
  0x16   :  { %31 = dma.hbm_to_vmem [thread:$0]  %s242_s1, 128, %s26_s12, [#allocation6], %s212_s17, %s212_s17, %s213_s18  }
  0x17   :  { %204 = dma.done.wait [#allocation3], 64  }
  0x18   :  { %205 = vsyncadd [#allocation3], 4294967232 }
  0x19   :  { %206 = dma.done.wait [#allocation6], 128  }
  0x1a   :  { %207 = vsyncadd [#allocation6], 4294967168  ;;  %v214_v0 = vmov 0.0   ;;  %vm215_vm0 = vmmov 0   ;;  %v143_v1 = vld [vmem:[#allocation5] sm:$0xff]   ;;  %vm48_vm1 = vcmask 130048  }
  0x1b   :  { %130 = vmatprep.subr.bf16.mxu0 %v214_v0  ;;  %132 = vmatprep.mubr.msk.bf16.mxu0 %vm215_vm0, %v214_v0  ;;  %v39_v2 = vld [vmem:[#allocation2] sm:$0xf]  ;;  %s216_s0 = smov [#allocation7]  }
  0x1c   :  { %131 = vmatpush3.bf16.msra.mxu0 %v143_v1  ;;  %s116_s21 = sshll.u32 %s216_s0, 4  ;;  %s117_s21 = int_to_ptr.vmem [resolvable:$true] %s116_s21 }
  0x1d   :  { %s184_s1 = scalar_lea.vmem %s117_s21, 128  ;;  %p189_p11 = scmp.lt.s32.totalorder %s117_s21, %s117_s21 }
  0x1e   :  { %p185_p10 = scmp.ne.s32.totalorder %s117_s21, %s184_s1  ;;  %p190_p12 = scmp.lt.s32.totalorder %s184_s1, %s184_s1 }
  0x1f   :  { %133 = vmatmul.mubr.msk.bf16.vlgmr.msra.gmra.mxu0 %vm48_vm1, %v39_v2 }
  0x20   :  { %p191_p13 = por %p190_p12, %p189_p11 }
  0x22   :  { %p192_p0 = pnand %p191_p13, %p185_p10 }
  0xdf   :  { %v86_v3 = vpop.f32.mrf.mxu0 }
  0xe0   :  { %v108_v4 = vmax.f32 %v86_v3, 0.0 }
  0xe1   :  { %v134_v5 = vpop.f32.mrf.mxu0 }
  0xe2   :  { %109 = vst [vmem:[#allocation7] sm:$0xff] %v108_v4 }
  0xe3   :  { %v89_v6 = vpop.f32.mrf.mxu0 }
  0xe4   :  { %195 = shalt.err (!%p192_p0)
}
  0xe5   :  { %119 = dma.vmem_to_hbm [thread:$0]  %s117_s21, 128, %s243_s2, [#allocation4]   ;;  %v135_v7 = vpop.f32.mrf.mxu0 }
  0xe6   :  { %208 = dma.done.wait [#allocation4], 128  }
  0xe7   :  { %209 = vsyncadd [#allocation4], 4294967168 }
  0xe8   :  { %123 = vsyncpa [#allocation3], 1 }
  0xe9   :  { %124 = vsyncpa [#allocation6], 1 }
  0xea   :  { %125 = vsyncpa [#allocation4], 1 }

</bundles_post_ra>
